<compile_context>
chip_gen: v7x
topology: tpu7x:2x2x1
jax: 0.10.0
libtpu: 0.0.40
codegen_flags: <defaults>
</compile_context>

<pallas_src>
import jax
import jax.numpy as jnp
from jax.experimental import pallas as pl
from jax.experimental.pallas import tpu as pltpu


def _round_up(x: int, m: int) -> int:
    return ((x + m - 1) // m) * m


def _mlp_head_kernel(x_ref, w1_ref, w2_ref, b2_ref, o_ref):
    # x_ref:  (Bt, H_aug)   — last column group carries the ones column for b1
    # w1_ref: (H_aug, H4p)  — row H carries b1, padding rows are zero
    # w2_ref: (H4p, Np)     b2_ref: (1, Np)     o_ref: (Bt, Np)
    h = jnp.dot(x_ref[...], w1_ref[...], preferred_element_type=jnp.float32)
    h = jnp.maximum(h, 0.0)                       # ReLU
    h = h.astype(w2_ref.dtype)                    # keep both MXU operands bf16 on the bf16 path
    out = jnp.dot(h, w2_ref[...], preferred_element_type=jnp.float32) + b2_ref[...]
    o_ref[...] = out.astype(o_ref.dtype)


def stock_selection_head(cls_token, w1, b1, w2, b2, *, use_bf16=False, block_b=256):
    """Pallas forward for StockSelectionHead.

    Args:
      cls_token: (B, H) float32
      w1: (H, 4H), b1: (4H,), w2: (4H, N), b2: (N,)   (weights are nn.Linear.weight.T)
      use_bf16: cast matmul inputs to bfloat16 (f32 accumulation) — v6e/v7x MXU fast path.
      block_b: row-tile size when batching (128 is the better choice on v5e).
    Returns:
      logits: (B, N) float32
    """
    B, H = cls_token.shape
    H4 = w1.shape[1]
    N = w2.shape[1]

    # ---- pad to TPU-friendly shapes (lane = 128, sublane = 8), fold b1 ----
    H_aug = _round_up(H + 1, 128)         # +1 slot for the ones column carrying b1
    H4p = _round_up(H4, 128)
    Np = _round_up(N, 128)
    Bp = _round_up(B, 8)
    if Bp > block_b:
        Bp = _round_up(Bp, block_b)

    compute_dtype = jnp.bfloat16 if use_bf16 else jnp.float32

    # x_aug = [ x | 1 | 0... ]  (padded batch rows are all-zero -> sliced off later)
    x_aug = jnp.zeros((Bp, H_aug), jnp.float32)
    x_aug = x_aug.at[:B, :H].set(cls_token.astype(jnp.float32))
    x_aug = x_aug.at[:B, H].set(1.0)

    # w1_aug rows: [ w1 ; b1 ; 0... ]   (padded hidden columns stay zero -> relu(0)=0)
    w1_aug = jnp.zeros((H_aug, H4p), jnp.float32)
    w1_aug = w1_aug.at[:H, :H4].set(w1)
    w1_aug = w1_aug.at[H, :H4].set(b1)

    w2_p = jnp.zeros((H4p, Np), jnp.float32).at[:H4, :N].set(w2)
    b2_p = jnp.zeros((1, Np), jnp.float32).at[0, :N].set(b2)

    x_aug = x_aug.astype(compute_dtype)
    w1_aug = w1_aug.astype(compute_dtype)
    w2_p = w2_p.astype(compute_dtype)
    # b2 stays f32 (added after f32 accumulation).

    out_shape = jax.ShapeDtypeStruct((Bp, Np), jnp.float32)

    if Bp <= block_b:
        # Single shot, no grid: whole problem resident in VMEM, minimal launch overhead.
        vmem = pl.BlockSpec(memory_space=pltpu.MemorySpace.VMEM)
        logits_p = pl.pallas_call(
            _mlp_head_kernel,
            out_shape=out_shape,
            in_specs=[vmem, vmem, vmem, vmem],
            out_specs=vmem,
        )(x_aug, w1_aug, w2_p, b2_p)
    else:
        # Row-tiled over the batch; "parallel" so v7x can shard tiles across both
        # TensorCores. Weight / bias block indices are constant -> stay VMEM-resident.
        grid = (Bp // block_b,)
        logits_p = pl.pallas_call(
            _mlp_head_kernel,
            out_shape=out_shape,
            grid=grid,
            in_specs=[
                pl.BlockSpec((block_b, H_aug), lambda i: (i, 0)),
                pl.BlockSpec((H_aug, H4p), lambda i: (0, 0)),
                pl.BlockSpec((H4p, Np), lambda i: (0, 0)),
                pl.BlockSpec((1, Np), lambda i: (0, 0)),
            ],
            out_specs=pl.BlockSpec((block_b, Np), lambda i: (i, 0)),
            compiler_params=pltpu.CompilerParams(
                dimension_semantics=("parallel",)
            ),
        )(x_aug, w1_aug, w2_p, b2_p)

    # TODO(synk): the biggest remaining win at tiny shapes is fusing this head into the
    # kernel that produces cls_token (avoids the HBM round-trip entirely).
    return logits_p[:B, :N]


def _init_linear_params(key, in_features, out_features):
    """Deterministic init mirroring nn.Linear's uniform(-1/sqrt(fan_in), +)."""
    kw, kb = jax.random.split(key)
    bound = 1.0 / jnp.sqrt(in_features)
    # Stored as (in_features, out_features) == PyTorch weight.T
    w = jax.random.uniform(kw, (in_features, out_features), jnp.float32, -bound, bound)
    b = jax.random.uniform(kb, (out_features,), jnp.float32, -bound, bound)
    return w, b


if __name__ == "__main__":
    hidden_dim = 32
    num_stocks = 64
    batch_size = 2

    key = jax.random.PRNGKey(0)
    k_x, k_l1, k_l2 = jax.random.split(key, 3)

    cls_token = jax.random.normal(k_x, (batch_size, hidden_dim), jnp.float32)
    w1, b1 = _init_linear_params(k_l1, hidden_dim, 4 * hidden_dim)
    w2, b2 = _init_linear_params(k_l2, 4 * hidden_dim, num_stocks)

    # Pure-JAX reference of the module's forward pass.
    ref = jnp.maximum(cls_token @ w1 + b1, 0.0) @ w2 + b2

    # f32 path (exact module semantics), small batch -> gridless path.
    logits = jax.block_until_ready(stock_selection_head(cls_token, w1, b1, w2, b2))
    assert logits.shape == (batch_size, num_stocks)
    assert jnp.allclose(logits, ref, atol=1e-5, rtol=1e-5)

    # bf16-MXU path (v6e / v7x fast path); looser tolerance for bf16 inputs.
    logits_bf16 = jax.block_until_ready(
        stock_selection_head(cls_token, w1, b1, w2, b2, use_bf16=True)
    )
    assert jnp.allclose(logits_bf16, ref, atol=5e-2, rtol=5e-2)

    # Batched path exercising the row-tiled "parallel" grid.
    big_b = 512
    x_big = jax.random.normal(jax.random.PRNGKey(1), (big_b, hidden_dim), jnp.float32)
    ref_big = jnp.maximum(x_big @ w1 + b1, 0.0) @ w2 + b2
    logits_big = jax.block_until_ready(stock_selection_head(x_big, w1, b1, w2, b2))
    assert logits_big.shape == (big_b, num_stocks)
    assert jnp.allclose(logits_big, ref_big, atol=1e-4, rtol=1e-4)

    print("KERNEL_OK")
</pallas_src>

<mosaic_0001>
module attributes {stable_mosaic.version = 11 : i64} {
  func.func @_mlp_head_kernel(%arg0: memref<8x128xf32, #tpu.memory_space<vmem>>, %arg1: memref<128x128xf32, #tpu.memory_space<vmem>>, %arg2: memref<128x128xf32, #tpu.memory_space<vmem>>, %arg3: memref<1x128xf32, #tpu.memory_space<vmem>>, %arg4: memref<8x128xf32, #tpu.memory_space<vmem>>) attributes {dimension_semantics = [], scalar_prefetch = 0 : i64, scratch_operands = 0 : i64, tpu.core_type = #tpu.core_type<tc>} {
    %c0 = arith.constant 0 : index
    %c0_0 = arith.constant 0 : index
    %0 = vector.load %arg0[%c0, %c0_0] : memref<8x128xf32, #tpu.memory_space<vmem>>, vector<8x128xf32>
    %c0_1 = arith.constant 0 : index
    %c0_2 = arith.constant 0 : index
    %1 = vector.load %arg1[%c0_1, %c0_2] : memref<128x128xf32, #tpu.memory_space<vmem>>, vector<128x128xf32>
    %cst = arith.constant dense<0.000000e+00> : vector<8x128xf32>
    %2 = tpu.matmul %0, %1, %cst {dimension_numbers = #tpu.dot_dimension_numbers<[1], [0], [0], [1], [0, 0, 1, 1], [], []>} : vector<8x128xf32>, vector<128x128xf32>, vector<8x128xf32> -> vector<8x128xf32>
    %cst_3 = arith.constant 0.000000e+00 : f32
    %3 = vector.broadcast %cst_3 : f32 to vector<8x128xf32>
    %4 = arith.maximumf %2, %3 : vector<8x128xf32>
    %c0_4 = arith.constant 0 : index
    %c0_5 = arith.constant 0 : index
    %5 = vector.load %arg2[%c0_4, %c0_5] : memref<128x128xf32, #tpu.memory_space<vmem>>, vector<128x128xf32>
    %cst_6 = arith.constant dense<0.000000e+00> : vector<8x128xf32>
    %6 = tpu.matmul %4, %5, %cst_6 {dimension_numbers = #tpu.dot_dimension_numbers<[1], [0], [0], [1], [0, 0, 1, 1], [], []>} : vector<8x128xf32>, vector<128x128xf32>, vector<8x128xf32> -> vector<8x128xf32>
    %c0_7 = arith.constant 0 : index
    %c0_8 = arith.constant 0 : index
    %7 = vector.load %arg3[%c0_7, %c0_8] : memref<1x128xf32, #tpu.memory_space<vmem>>, vector<1x128xf32>
    %8 = vector.broadcast %7 : vector<1x128xf32> to vector<8x128xf32>
    %9 = arith.addf %6, %8 : vector<8x128xf32>
    %c0_9 = arith.constant 0 : index
    %c0_10 = arith.constant 0 : index
    %10 = vector.load %arg4[%c0_9, %c0_10] : memref<8x128xf32, #tpu.memory_space<vmem>>, vector<8x128xf32>
    tpu.vector_store %arg4[%c0_9, %c0_10], %9 {strides = array<i32>} : memref<8x128xf32, #tpu.memory_space<vmem>>, vector<8x128xf32>,
    return
  }
}

</mosaic_0001>

<bundles_post_ra>
// kernel: tpu_custom_call.1
= control target key start
LH: loop header
LB: loop body
LE: loop exit
PB: predicated region body
PF: predicated region fallthrough
CT: control target
= control target key end

     0   :  { %9 = vsyncpa [#allocation3], 0  ;;  %s618_s0 = inlined_call_operand.hbm [shape: f32[8,128], index: 0, kind: input, shape index: {}]   ;;  %s619_s1 = inlined_call_operand.hbm [shape: f32[128,128], index: 1, kind: input, shape index: {}]   ;;  %s620_s2 = inlined_call_operand.hbm [shape: f32[128,128], index: 2, kind: input, shape index: {}]   ;;  %s621_s3 = inlined_call_operand.vmem [shape: f32[1,128], index: 3, kind: input, shape index: {}]   ;;  %s622_s4 = inlined_call_operand.hbm [shape: f32[8,128], index: 4, kind: output, shape index: {}]  }
   0x1   :  { %10 = vsyncpa [#allocation6], 0 }
   0x2   :  { %11 = vsyncpa [#allocation4], 0  ;;  %s511_s15 = smov [#allocation5]   ;;  %s417_s19 = scalar_lea.hbm %s619_s1, 2048 }
   0x3   :  { %s27_s16 = sshll.u32 %s511_s15, 4  ;;  %p418_p0 = scmp.ne.s32.totalorder %s619_s1, %s417_s19  ;;  %s28_s16 = int_to_ptr.vmem [resolvable:$true] %s27_s16 }
   0x4   :  { %p421_p1 = scmp.lt.u32.totalorder %s417_s19, %s619_s1 }
   0x6   :  { %p423_p2 = pnand %p421_p1, %p418_p0 }
   0x8   :  { %426 = shalt.err (!%p423_p2)
}
   0x9   :  { %s427_s24 = scalar_lea.vmem %s28_s16, 2048  ;;  %p432_p4 = scmp.lt.s32.totalorder %s28_s16, %s28_s16 }
   0xa   :  { %p428_p3 = scmp.ne.s32.totalorder %s28_s16, %s427_s24  ;;  %p433_p5 = scmp.lt.s32.totalorder %s427_s24, %s427_s24 }
   0xc   :  { %p434_p6 = por %p433_p5, %p432_p4 }
   0xe   :  { %p435_p7 = pnand %p434_p6, %p428_p3 }
  0x10   :  { %438 = shalt.err (!%p435_p7)
}
  0x11   :  { %s512_s25 = smov 128   ;;  %s513_s26 = smov 8  }
  0x12   :  { %33 = dma.hbm_to_vmem [thread:$0]  %s619_s1, 2048, %s28_s16, [#allocation6], %s512_s25, %s512_s25, %s513_s26  }
  0x13   :  { %s514_s29 = smov [#allocation2]   ;;  %s515_s5 = smov [#allocation7]  }
  0x14   :  { %s18_s30 = sshll.u32 %s514_s29, 4  ;;  %s39_s6 = sshll.u32 %s515_s5, 4  ;;  %s19_s30 = int_to_ptr.vmem [resolvable:$true] %s18_s30  ;;  %s40_s6 = int_to_ptr.vmem [resolvable:$true] %s39_s6 }
  0x15   :  { %s439_s9 = scalar_lea.hbm %s618_s0, 128 }
  0x16   :  { %p440_p8 = scmp.ne.s32.totalorder %s618_s0, %s439_s9  ;;  %p443_p9 = scmp.lt.u32.totalorder %s439_s9, %s618_s0 }
  0x18   :  { %p445_p10 = pnand %p443_p9, %p440_p8 }
  0x1a   :  { %448 = shalt.err (!%p445_p10)
}
  0x1b   :  { %s449_s1 = scalar_lea.vmem %s19_s30, 128  ;;  %p454_p12 = scmp.lt.s32.totalorder %s19_s30, %s19_s30 }
  0x1c   :  { %p450_p11 = scmp.ne.s32.totalorder %s19_s30, %s449_s1  ;;  %p455_p13 = scmp.lt.s32.totalorder %s449_s1, %s449_s1 }
  0x1e   :  { %p456_p0 = por %p455_p13, %p454_p12 }
  0x20   :  { %p457_p1 = pnand %p456_p0, %p450_p11 }
  0x22   :  { %460 = shalt.err (!%p457_p1)
}
  0x23   :  { %21 = dma.hbm_to_vmem [thread:$0]  %s618_s0, 128, %s19_s30, [#allocation3]  }
  0x24   :  { %s461_s18 = scalar_lea.hbm %s620_s2, 2048 }
  0x25   :  { %p462_p2 = scmp.ne.s32.totalorder %s620_s2, %s461_s18  ;;  %p465_p3 = scmp.lt.u32.totalorder %s461_s18, %s620_s2 }
  0x27   :  { %p467_p4 = pnand %p465_p3, %p462_p2 }
  0x29   :  { %470 = shalt.err (!%p467_p4)
}
  0x2a   :  { %s471_s23 = scalar_lea.vmem %s40_s6, 2048  ;;  %p476_p6 = scmp.lt.s32.totalorder %s40_s6, %s40_s6 }
  0x2b   :  { %p472_p5 = scmp.ne.s32.totalorder %s40_s6, %s471_s23  ;;  %p477_p7 = scmp.lt.s32.totalorder %s471_s23, %s471_s23 }
  0x2d   :  { %p478_p8 = por %p477_p7, %p476_p6 }
  0x2f   :  { %p479_p9 = pnand %p478_p8, %p472_p5 }
  0x31   :  { %482 = shalt.err (!%p479_p9)
}
  0x32   :  { %45 = dma.hbm_to_vmem [thread:$0]  %s620_s2, 2048, %s40_s6, [#allocation6], %s512_s25, %s512_s25, %s513_s26  }
  0x33   :  { %505 = dma.done.wait [#allocation3], 128  }
  0x34   :  { %506 = vsyncadd [#allocation3], 4294967168 }
  0x35   :  { %507 = dma.done.wait [#allocation6], 4096  }
  0x36   :  { %508 = vsyncadd [#allocation6], 4294963200  ;;  %v516_v0 = vmov 0.0|0.0   ;;  %vm517_vm0 = vmmov 0   ;;  %v518_v1 = vmov 0.0   ;;  %v58_v2 = vld [vmem:[#allocation5] sm:$0xff] }
  0x37   :  { %360 = vmatprep.subr.bf16.mxu0 %v516_v0  ;;  %322 = vmatprep.mubr.msk.f32.mxu0 %vm517_vm0, %v518_v1  ;;  %v59_v3 = vld [vmem:[#allocation5 + $0x8] sm:$0xff]  ;;  %v60_v4 = vld [vmem:[#allocation5 + $0x10] sm:$0xff]  ;;  %v61_v6 = vld [vmem:[#allocation5 + $0x18] sm:$0xff]  ;;  %s519_s26 = smov [#allocation8]  }
  0x38   :  { %384 = vmatprep.subr.bf16.mxu1 %v516_v0  ;;  %357 = vmatprep.mubr.msk.f32.mxu1 %vm517_vm0, %v518_v1  ;;  %v361_v5 = vpack.c.bf16 %v59_v3, %v58_v2  ;;  %v364_v7 = vpack.c.bf16 %v61_v6, %v60_v4  ;;  %v62_v8 = vld [vmem:[#allocation5 + $0x20] sm:$0xff]  ;;  %v63_v9 = vld [vmem:[#allocation5 + $0x28] sm:$0xff]  ;;  %v147_v12 = vld [vmem:[#allocation7 + $0x10] sm:$0xff]  ;;  %s245_s27 = sshll.u32 %s519_s26, 4  ;;  %s246_s27 = int_to_ptr.vmem [resolvable:$true] %s245_s27 }
  0x39   :  { %v145_v10 = vld [vmem:[#allocation7] sm:$0xff]  ;;  %v146_v11 = vld [vmem:[#allocation7 + $0x8] sm:$0xff]  ;;  %v148_v13 = vld [vmem:[#allocation7 + $0x18] sm:$0xff]  ;;  %v367_v14 = vpack.c.bf16 %v63_v9, %v62_v8  ;;  %s483_s28 = scalar_lea.vmem %s246_s27, 128  ;;  %p488_p11 = scmp.lt.s32.totalorder %s246_s27, %s246_s27 }
  0x3a   :  { %362 = vmatpush3.bf16.msra.mxu0 %v361_v5  ;;  %v385_v15 = vpack.c.bf16 %v146_v11, %v145_v10  ;;  %v64_v16 = vld [vmem:[#allocation5 + $0x30] sm:$0xff]  ;;  %v65_v17 = vld [vmem:[#allocation5 + $0x38] sm:$0xff]  ;;  %v388_v18 = vpack.c.bf16 %v148_v13, %v147_v12  ;;  %v149_v19 = vld [vmem:[#allocation7 + $0x20] sm:$0xff]  ;;  %p484_p10 = scmp.ne.s32.totalorder %s246_s27, %s483_s28  ;;  %p489_p12 = scmp.lt.s32.totalorder %s483_s28, %s483_s28 }
  0x3b   :  { %363 = vmatprep.subr.bf16.mxu0 %v516_v0  ;;  %v150_v20 = vld [vmem:[#allocation7 + $0x28] sm:$0xff]  ;;  %v370_v21 = vpack.c.bf16 %v65_v17, %v64_v16  ;;  %v66_v22 = vld [vmem:[#allocation5 + $0x40] sm:$0xff]  ;;  %v151_v25 = vld [vmem:[#allocation7 + $0x30] sm:$0xff] }
  0x3c   :  { %386 = vmatpush3.bf16.msra.mxu1 %v385_v15  ;;  %v67_v23 = vld [vmem:[#allocation5 + $0x48] sm:$0xff]  ;;  %v391_v24 = vpack.c.bf16 %v150_v20, %v149_v19  ;;  %v152_v26 = vld [vmem:[#allocation7 + $0x38] sm:$0xff]  ;;  %v68_v28 = vld [vmem:[#allocation5 + $0x50] sm:$0xff]  ;;  %p490_p13 = por %p489_p12, %p488_p11 }
  0x3d   :  { %387 = vmatprep.subr.bf16.mxu1 %v516_v0  ;;  %v373_v27 = vpack.c.bf16 %v67_v23, %v66_v22  ;;  %v69_v29 = vld [vmem:[#allocation5 + $0x58] sm:$0xff]  ;;  %v394_v30 = vpack.c.bf16 %v152_v26, %v151_v25  ;;  %v153_v31 = vld [vmem:[#allocation7 + $0x40] sm:$0xff]  ;;  %v154_v32 = vld [vmem:[#allocation7 + $0x48] sm:$0xff] }
  0x3e   :  { %365 = vmatpush3.bf16.msra.mxu0 %v364_v7  ;;  %v376_v33 = vpack.c.bf16 %v69_v29, %v68_v28  ;;  %v70_v34 = vld [vmem:[#allocation5 + $0x60] sm:$0xff]  ;;  %v71_v35 = vld [vmem:[#allocation5 + $0x68] sm:$0xff]  ;;  %v397_v36 = vpack.c.bf16 %v154_v32, %v153_v31  ;;  %v155_v37 = vld [vmem:[#allocation7 + $0x50] sm:$0xff]  ;;  %p491_p0 = pnand %p490_p13, %p484_p10 }
  0x3f   :  { %366 = vmatprep.subr.bf16.mxu0 %v516_v0  ;;  %v156_v38 = vld [vmem:[#allocation7 + $0x58] sm:$0xff]  ;;  %v379_v39 = vpack.c.bf16 %v71_v35, %v70_v34  ;;  %v72_v40 = vld [vmem:[#allocation5 + $0x70] sm:$0xff]  ;;  %v157_v43 = vld [vmem:[#allocation7 + $0x60] sm:$0xff] }
  0x40   :  { %389 = vmatpush3.bf16.msra.mxu1 %v388_v18  ;;  %v73_v41 = vld [vmem:[#allocation5 + $0x78] sm:$0xff]  ;;  %v400_v42 = vpack.c.bf16 %v156_v38, %v155_v37  ;;  %v158_v44 = vld [vmem:[#allocation7 + $0x68] sm:$0xff]  ;;  %v159_v48 = vld [vmem:[#allocation7 + $0x70] sm:$0xff] }
  0x41   :  { %390 = vmatprep.subr.bf16.mxu1 %v516_v0  ;;  %v382_v45 = vpack.c.bf16 %v73_v41, %v72_v40  ;;  %v403_v46 = vpack.c.bf16 %v158_v44, %v157_v43  ;;  %v57_v47 = vld [vmem:[#allocation2] sm:$0xff] }
  0x42   :  { %368 = vmatpush3.bf16.msra.mxu0 %v367_v14  ;;  %v160_v49 = vld [vmem:[#allocation7 + $0x78] sm:$0xff] }
  0x43   :  { %369 = vmatprep.subr.bf16.mxu0 %v516_v0  ;;  %v406_v50 = vpack.c.bf16 %v160_v49, %v159_v48  ;;  %v255_v54 = vld [vmem:[%s621_s3] ss:$0 sm:$0xff] }
  0x44   :  { %392 = vmatpush3.bf16.msra.mxu1 %v391_v24 }
  0x45   :  { %393 = vmatprep.subr.bf16.mxu1 %v516_v0 }
  0x46   :  { %371 = vmatpush3.bf16.msra.mxu0 %v370_v21 }
  0x47   :  { %372 = vmatprep.subr.bf16.mxu0 %v516_v0 }
  0x48   :  { %395 = vmatpush3.bf16.msra.mxu1 %v394_v30 }
  0x49   :  { %396 = vmatprep.subr.bf16.mxu1 %v516_v0 }
  0x4a   :  { %374 = vmatpush3.bf16.msra.mxu0 %v373_v27 }
  0x4b   :  { %375 = vmatprep.subr.bf16.mxu0 %v516_v0 }
  0x4c   :  { %398 = vmatpush3.bf16.msra.mxu1 %v397_v36 }
  0x4d   :  { %399 = vmatprep.subr.bf16.mxu1 %v516_v0 }
  0x4e   :  { %377 = vmatpush3.bf16.msra.mxu0 %v376_v33 }
  0x4f   :  { %378 = vmatprep.subr.bf16.mxu0 %v516_v0 }
  0x50   :  { %401 = vmatpush3.bf16.msra.mxu1 %v400_v42 }
  0x51   :  { %402 = vmatprep.subr.bf16.mxu1 %v516_v0 }
  0x52   :  { %380 = vmatpush3.bf16.msra.mxu0 %v379_v39 }
  0x53   :  { %381 = vmatprep.subr.bf16.mxu0 %v516_v0 }
  0x54   :  { %404 = vmatpush3.bf16.msra.mxu1 %v403_v46 }
  0x55   :  { %405 = vmatprep.subr.bf16.mxu1 %v516_v0 }
  0x56   :  { %383 = vmatpush3.bf16.msra.mxu0 %v382_v45 }
  0x58   :  { %407 = vmatpush3.bf16.msra.mxu1 %v406_v50 }
  0x59   :  { %323 = vmatmul.mubr.f32.vlgmr.msra.gmra.mrb[0].mxu0 %v57_v47 }
 0x12c   :  { %v140_v51 = vpop.f32.mrb[0].mxu0 }
 0x12d   :  { %v144_v52 = vmax.f32 %v140_v51, 0.0  ;;  %v324_v53 = vpop.f32.mrb[1].mxu0 }
 0x12f   :  { %358 = vmatmul.mubr.f32.vlgmr.msra.gmra.mrb[0].mxu1 %v144_v52 }
 0x202   :  { %v234_v55 = vpop.f32.mrb[0].mxu1 }
 0x203   :  { %v235_v56 = vadd.f32 %v255_v54, %v234_v55  ;;  %v359_v57 = vpop.f32.mrb[1].mxu1 }
 0x205   :  { %238 = vst [vmem:[#allocation8] sm:$0xff] %v235_v56 }
 0x206   :  { %494 = shalt.err (!%p491_p0)
}
 0x207   :  { %s495_s5 = scalar_lea.hbm %s622_s4, 128 }
 0x208   :  { %p496_p1 = scmp.ne.s32.totalorder %s622_s4, %s495_s5  ;;  %p499_p2 = scmp.lt.u32.totalorder %s495_s5, %s622_s4 }
 0x20a   :  { %p501_p3 = pnand %p499_p2, %p496_p1 }
 0x20c   :  { %504 = shalt.err (!%p501_p3)
}
 0x20d   :  { %248 = dma.vmem_to_hbm [thread:$0]  %s246_s27, 128, %s622_s4, [#allocation4]  }
 0x20e   :  { %509 = dma.done.wait [#allocation4], 128  }
 0x20f   :  { %510 = vsyncadd [#allocation4], 4294967168 }
 0x210   :  { %252 = vsyncpa [#allocation3], 1 }
 0x211   :  { %253 = vsyncpa [#allocation6], 1 }
 0x212   :  { %254 = vsyncpa [#allocation4], 1 }

</bundles_post_ra>
